<compile_context>
chip_gen: v7x
topology: tpu7x:2x2x1
jax: 0.10.0
libtpu: 0.0.40
codegen_flags: <defaults>
</compile_context>

<pallas_src>
import jax
import jax.numpy as jnp
from jax.experimental import pallas as pl
from jax.experimental.pallas import tpu as pltpu

LANE = 128
SUBLANE = 8
MIB = 1024 * 1024


def _round_up(v, m):
    return ((v + m - 1) // m) * m


def _pad2(m, rows, cols):
    r, c = m.shape
    return jnp.pad(m, ((0, rows - r), (0, cols - c)))


def _vmem_limit(per_step_bytes):
    # Double-buffered blocks + headroom; floor at the 32 MiB scoped default,
    # stay comfortably under v7x's 64 MiB physical VMEM.
    return int(min(max(4 * per_step_bytes, 32 * MIB), 56 * MIB))


# ----------------------------------------------------------------------------
# Pass 1: per-node feature transform (no graph structure involved).
#   zl = x @ Wl            (bf16, fed to the propagation matmul)
#   zr = x @ Wr + b        (f32, root/bias term consumed at finalize of pass 2)
# ----------------------------------------------------------------------------
def transform_kernel(x_ref, wl_ref, wr_ref, b_ref, zl_ref, zr_ref):
    x = x_ref[...]
    zl = jnp.dot(x, wl_ref[...], preferred_element_type=jnp.float32)
    zr = jnp.dot(x, wr_ref[...], preferred_element_type=jnp.float32) + b_ref[...]
    zl_ref[...] = zl.astype(zl_ref.dtype)
    zr_ref[...] = zr.astype(zr_ref.dtype)


def _transform(x_p, wl_p, wr_p, b_p, *, tm):
    n_p, cin_p = x_p.shape
    cout_p = wl_p.shape[1]
    gm = n_p // tm

    flops = 2 * 2 * n_p * cin_p * cout_p
    bytes_accessed = (n_p * cin_p * 2 + 2 * cin_p * cout_p * 2 + cout_p * 4
                      + n_p * cout_p * (2 + 4))
    per_step = (tm * cin_p * 2 + 2 * cin_p * cout_p * 2 + cout_p * 4
                + tm * cout_p * (2 + 4))

    return pl.pallas_call(
        transform_kernel,
        out_shape=(jax.ShapeDtypeStruct((n_p, cout_p), jnp.bfloat16),
                   jax.ShapeDtypeStruct((n_p, cout_p), jnp.float32)),
        grid_spec=pltpu.PrefetchScalarGridSpec(
            num_scalar_prefetch=0,
            grid=(gm,),
            in_specs=[
                pl.BlockSpec((tm, cin_p), lambda i: (i, 0)),         # x rows
                pl.BlockSpec((cin_p, cout_p), lambda i: (0, 0)),     # Wl
                pl.BlockSpec((cin_p, cout_p), lambda i: (0, 0)),     # Wr
                pl.BlockSpec((1, cout_p), lambda i: (0, 0)),         # bias
            ],
            out_specs=[pl.BlockSpec((tm, cout_p), lambda i: (i, 0)),
                       pl.BlockSpec((tm, cout_p), lambda i: (i, 0))],
        ),
        compiler_params=pltpu.CompilerParams(
            dimension_semantics=("parallel",),
            vmem_limit_bytes=_vmem_limit(per_step)),
        cost_estimate=pl.CostEstimate(flops=int(flops), transcendentals=0,
                                      bytes_accessed=int(bytes_accessed)),
    )(x_p, wl_p, wr_p, b_p)


# ----------------------------------------------------------------------------
# Shared accumulation body:  acc += A_block @ z_block  (f32 VMEM accumulator)
# ----------------------------------------------------------------------------
def _accumulate(a_ref, z_ref, acc_ref):
    k = pl.program_id(1)

    @pl.when(k == 0)
    def _():
        acc_ref[...] = jnp.zeros_like(acc_ref)

    acc_ref[...] += jnp.dot(a_ref[...], z_ref[...],
                            preferred_element_type=jnp.float32)


# ----------------------------------------------------------------------------
# Pass 2: propagate layer-1, apply relu, and fuse layer-2's feature transform.
# h never touches HBM.
# ----------------------------------------------------------------------------
def prop_fuse_kernel(a_ref, z_ref, r_ref, dinv_ref, wl_ref, wr_ref, b_ref,
                     zl_ref, zr_ref, acc_ref):
    _accumulate(a_ref, z_ref, acc_ref)

    @pl.when(pl.program_id(1) == pl.num_programs(1) - 1)
    def _():
        h = jnp.maximum(acc_ref[...] * dinv_ref[...] + r_ref[...], 0.0)
        hb = h.astype(jnp.bfloat16)
        zl = jnp.dot(hb, wl_ref[...], preferred_element_type=jnp.float32)
        zr = jnp.dot(hb, wr_ref[...], preferred_element_type=jnp.float32) + b_ref[...]
        zl_ref[...] = zl.astype(zl_ref.dtype)
        zr_ref[...] = zr.astype(zr_ref.dtype)


def _propagate_fuse(a_p, z_p, r_p, dinv_p, wl_p, wr_p, b_p, *, tm, tk):
    n_p = a_p.shape[0]
    c_in = z_p.shape[1]       # lane width of the propagation (= layer-1 out)
    c_out = wl_p.shape[1]     # layer-2 out width
    gm, gk = n_p // tm, n_p // tk

    flops = 2 * n_p * n_p * c_in + 2 * 2 * n_p * c_in * c_out
    bytes_accessed = (n_p * n_p * 2 + gm * n_p * c_in * 2 + n_p * c_in * 4
                      + n_p * 4 + 2 * c_in * c_out * 2 + c_out * 4
                      + n_p * c_out * (2 + 4))
    per_step = (tm * tk * 2 + tk * c_in * 2 + tm * c_in * 4 + tm * 4
                + 2 * c_in * c_out * 2 + c_out * 4
                + tm * c_out * (2 + 4) + tm * c_in * 4)

    return pl.pallas_call(
        prop_fuse_kernel,
        out_shape=(jax.ShapeDtypeStruct((n_p, c_out), jnp.bfloat16),
                   jax.ShapeDtypeStruct((n_p, c_out), jnp.float32)),
        grid_spec=pltpu.PrefetchScalarGridSpec(
            num_scalar_prefetch=0,
            grid=(gm, gk),
            in_specs=[
                pl.BlockSpec((tm, tk), lambda i, k: (i, k)),         # A block
                pl.BlockSpec((tk, c_in), lambda i, k: (k, 0)),       # z1 (neighbors)
                pl.BlockSpec((tm, c_in), lambda i, k: (i, 0)),       # r1 (root, resident)
                pl.BlockSpec((tm, 1), lambda i, k: (i, 0)),          # dinv
                pl.BlockSpec((c_in, c_out), lambda i, k: (0, 0)),    # Wl2
                pl.BlockSpec((c_in, c_out), lambda i, k: (0, 0)),    # Wr2
                pl.BlockSpec((1, c_out), lambda i, k: (0, 0)),       # b2
            ],
            out_specs=[pl.BlockSpec((tm, c_out), lambda i, k: (i, 0)),
                       pl.BlockSpec((tm, c_out), lambda i, k: (i, 0))],
            scratch_shapes=[pltpu.VMEM((tm, c_in), jnp.float32)],
        ),
        compiler_params=pltpu.CompilerParams(
            dimension_semantics=("parallel", "arbitrary"),
            vmem_limit_bytes=_vmem_limit(per_step)),
        cost_estimate=pl.CostEstimate(flops=int(flops), transcendentals=0,
                                      bytes_accessed=int(bytes_accessed)),
    )(a_p, z_p, r_p, dinv_p, wl_p, wr_p, b_p)


# ----------------------------------------------------------------------------
# Pass 3: propagate layer-2 and add its (precomputed) root/bias term.
# ----------------------------------------------------------------------------
def prop_out_kernel(a_ref, z_ref, r_ref, dinv_ref, o_ref, acc_ref):
    _accumulate(a_ref, z_ref, acc_ref)

    @pl.when(pl.program_id(1) == pl.num_programs(1) - 1)
    def _():
        o_ref[...] = (acc_ref[...] * dinv_ref[...]
                      + r_ref[...]).astype(o_ref.dtype)


def _propagate_out(a_p, z_p, r_p, dinv_p, *, tm, tk, out_dtype=jnp.float32):
    n_p = a_p.shape[0]
    c = z_p.shape[1]
    gm, gk = n_p // tm, n_p // tk
    itemsize = jnp.dtype(out_dtype).itemsize

    flops = 2 * n_p * n_p * c
    bytes_accessed = (n_p * n_p * 2 + gm * n_p * c * 2 + n_p * c * 4
                      + n_p * 4 + n_p * c * itemsize)
    per_step = (tm * tk * 2 + tk * c * 2 + tm * c * 4 + tm * 4
                + tm * c * itemsize + tm * c * 4)

    return pl.pallas_call(
        prop_out_kernel,
        out_shape=jax.ShapeDtypeStruct((n_p, c), out_dtype),
        grid_spec=pltpu.PrefetchScalarGridSpec(
            num_scalar_prefetch=0,
            grid=(gm, gk),
            in_specs=[
                pl.BlockSpec((tm, tk), lambda i, k: (i, k)),     # A block
                pl.BlockSpec((tk, c), lambda i, k: (k, 0)),      # z2 (neighbors)
                pl.BlockSpec((tm, c), lambda i, k: (i, 0)),      # r2 (root, resident)
                pl.BlockSpec((tm, 1), lambda i, k: (i, 0)),      # dinv
            ],
            out_specs=pl.BlockSpec((tm, c), lambda i, k: (i, 0)),
            scratch_shapes=[pltpu.VMEM((tm, c), jnp.float32)],
        ),
        compiler_params=pltpu.CompilerParams(
            dimension_semantics=("parallel", "arbitrary"),
            vmem_limit_bytes=_vmem_limit(per_step)),
        cost_estimate=pl.CostEstimate(flops=int(flops), transcendentals=0,
                                      bytes_accessed=int(bytes_accessed)),
    )(a_p, z_p, r_p, dinv_p)


def sage_encoder(x, edge_index, wl1, bl1, wr1, wl2, bl2, wr2):
    """SAGEEncoder forward. Weights are [in, out]; bl* are the lin_l biases."""
    n, cin = x.shape
    hid = wl1.shape[1]
    cout = wl2.shape[1]

    # Dense binary adjacency (message src -> dst  =>  row = dst, col = src),
    # NO self-loops (SAGEConv), plus mean-aggregation row scale 1/deg_in.
    # TODO(synk): for large graphs replace the dense O(N^2) adjacency with a
    # CSR row-block SpMM driven by PrefetchScalarGridSpec scalar prefetch.
    src, dst = edge_index[0], edge_index[1]
    a = jnp.zeros((n, n), jnp.float32).at[dst, src].add(1.0)
    deg = a.sum(axis=1)
    dinv = jnp.where(deg > 0, 1.0 / deg, 0.0)

    # Padded sizes: channels lane-dense (128), rows divisible by the tiles.
    cin_p = _round_up(cin, LANE)
    hid_p = _round_up(hid, LANE)
    cout_p = _round_up(cout, LANE)
    n8 = _round_up(n, SUBLANE)
    if n8 <= 512:
        tm = tk = n_p = n8
    else:
        tm, tk = 256, 512
        n_p = _round_up(n, 512)

    a_p = _pad2(a, n_p, n_p).astype(jnp.bfloat16)            # binary -> exact in bf16
    x_p = _pad2(x, n_p, cin_p).astype(jnp.bfloat16)
    dinv_p = _pad2(dinv[:, None], n_p, 1).astype(jnp.float32)
    wl1_p = _pad2(wl1, cin_p, hid_p).astype(jnp.bfloat16)
    wr1_p = _pad2(wr1, cin_p, hid_p).astype(jnp.bfloat16)
    bl1_p = _pad2(bl1.reshape(1, -1), 1, hid_p).astype(jnp.float32)
    wl2_p = _pad2(wl2, hid_p, cout_p).astype(jnp.bfloat16)
    wr2_p = _pad2(wr2, hid_p, cout_p).astype(jnp.bfloat16)
    bl2_p = _pad2(bl2.reshape(1, -1), 1, cout_p).astype(jnp.float32)

    # Pass 1: z1 = x @ Wl1 (bf16), r1 = x @ Wr1 + b1 (f32)
    z1, r1 = _transform(x_p, wl1_p, wr1_p, bl1_p, tm=tm)
    # Pass 2: h = relu(dinv * (A @ z1) + r1) fused with layer-2 transform.
    z2, r2 = _propagate_fuse(a_p, z1, r1, dinv_p, wl2_p, wr2_p, bl2_p,
                             tm=tm, tk=tk)
    # Pass 3: out = dinv * (A @ z2) + r2
    out = _propagate_out(a_p, z2, r2, dinv_p, tm=tm, tk=tk,
                         out_dtype=jnp.float32)
    return out[:n, :cout]


if __name__ == "__main__":
    # Small deterministic problem: 16 nodes, in_channels=8, out_channels=4 (hidden=8).
    N, IN_C, OUT_C = 16, 8, 4
    HID = 2 * OUT_C

    key = jax.random.PRNGKey(0)
    kx, k1, k2, k3, k4, k5, k6 = jax.random.split(key, 7)

    x = jax.random.normal(kx, (N, IN_C), dtype=jnp.float32)

    # Deterministic bidirectional ring graph: edge_index [2, E].
    src = jnp.arange(N, dtype=jnp.int32)
    dst = (src + 1) % N
    edge_index = jnp.stack(
        [jnp.concatenate([src, dst]), jnp.concatenate([dst, src])], axis=0)

    # SAGEConv parameters (stored as [in, out]; lin_l has bias, lin_r does not).
    wl1 = jax.random.normal(k1, (IN_C, HID), jnp.float32) / jnp.sqrt(IN_C)
    wr1 = jax.random.normal(k2, (IN_C, HID), jnp.float32) / jnp.sqrt(IN_C)
    bl1 = jax.random.normal(k3, (1, HID), jnp.float32) * 0.01
    wl2 = jax.random.normal(k4, (HID, OUT_C), jnp.float32) / jnp.sqrt(HID)
    wr2 = jax.random.normal(k5, (HID, OUT_C), jnp.float32) / jnp.sqrt(HID)
    bl2 = jax.random.normal(k6, (1, OUT_C), jnp.float32) * 0.01

    out = sage_encoder(x, edge_index, wl1, bl1, wr1, wl2, bl2, wr2)
    jax.block_until_ready(out)

    # Pure-JAX f32 reference (SAGEConv, aggr='mean', root_weight=True).
    a_ref = jnp.zeros((N, N), jnp.float32).at[edge_index[1], edge_index[0]].add(1.0)
    deg_ref = a_ref.sum(axis=1)
    a_mean = jnp.where(deg_ref > 0, 1.0 / deg_ref, 0.0)[:, None] * a_ref
    h_ref = jnp.maximum(a_mean @ x @ wl1 + bl1 + x @ wr1, 0.0)
    ref = a_mean @ h_ref @ wl2 + bl2 + h_ref @ wr2

    assert out.shape == (N, OUT_C)
    # bf16 activations/weights in the kernel -> loose-but-meaningful tolerance.
    assert jnp.allclose(out, ref, atol=1e-1, rtol=1e-1), float(
        jnp.max(jnp.abs(out - ref)))

    print("KERNEL_OK")
</pallas_src>

<mosaic_0001>
module attributes {stable_mosaic.version = 11 : i64} {
  func.func @transform_kernel(%arg0: i32, %arg1: memref<16x128xbf16, #tpu.memory_space<vmem>>, %arg2: memref<128x128xbf16, #tpu.memory_space<vmem>>, %arg3: memref<128x128xbf16, #tpu.memory_space<vmem>>, %arg4: memref<1x128xf32, #tpu.memory_space<vmem>>, %arg5: memref<16x128xbf16, #tpu.memory_space<vmem>>, %arg6: memref<16x128xf32, #tpu.memory_space<vmem>>) attributes {dimension_semantics = [#tpu.dimension_semantics<parallel>], iteration_bounds = array<i64: 1>, scalar_prefetch = 0 : i64, scratch_operands = 0 : i64, tpu.core_type = #tpu.core_type<tc>, window_params = [{transform_indices = @transform_0, window_bounds = array<i64: 16, 128>}, {pipeline_mode = #tpu.pipeline_mode<synchronous>, transform_indices = @transform_1, window_bounds = array<i64: 128, 128>}, {pipeline_mode = #tpu.pipeline_mode<synchronous>, transform_indices = @transform_2, window_bounds = array<i64: 128, 128>}, {pipeline_mode = #tpu.pipeline_mode<synchronous>, transform_indices = @transform_3, window_bounds = array<i64: 1, 128>}, {transform_indices = @transform_4, window_bounds = array<i64: 16, 128>}, {transform_indices = @transform_5, window_bounds = array<i64: 16, 128>}]} {
    %c0 = arith.constant 0 : index
    %c0_0 = arith.constant 0 : index
    %0 = vector.load %arg1[%c0, %c0_0] : memref<16x128xbf16, #tpu.memory_space<vmem>>, vector<16x128xbf16>
    %c0_1 = arith.constant 0 : index
    %c0_2 = arith.constant 0 : index
    %1 = vector.load %arg2[%c0_1, %c0_2] : memref<128x128xbf16, #tpu.memory_space<vmem>>, vector<128x128xbf16>
    %cst = arith.constant dense<0.000000e+00> : vector<16x128xf32>
    %2 = tpu.matmul %0, %1, %cst {dimension_numbers = #tpu.dot_dimension_numbers<[1], [0], [0], [1], [0, 0, 1, 1], [], []>} : vector<16x128xbf16>, vector<128x128xbf16>, vector<16x128xf32> -> vector<16x128xf32>
    %c0_3 = arith.constant 0 : index
    %c0_4 = arith.constant 0 : index
    %3 = vector.load %arg3[%c0_3, %c0_4] : memref<128x128xbf16, #tpu.memory_space<vmem>>, vector<128x128xbf16>
    %cst_5 = arith.constant dense<0.000000e+00> : vector<16x128xf32>
    %4 = tpu.matmul %0, %3, %cst_5 {dimension_numbers = #tpu.dot_dimension_numbers<[1], [0], [0], [1], [0, 0, 1, 1], [], []>} : vector<16x128xbf16>, vector<128x128xbf16>, vector<16x128xf32> -> vector<16x128xf32>
    %c0_6 = arith.constant 0 : index
    %c0_7 = arith.constant 0 : index
    %5 = vector.load %arg4[%c0_6, %c0_7] : memref<1x128xf32, #tpu.memory_space<vmem>>, vector<1x128xf32>
    %6 = vector.broadcast %5 : vector<1x128xf32> to vector<16x128xf32>
    %7 = arith.addf %4, %6 : vector<16x128xf32>
    %8 = arith.truncf %2 : vector<16x128xf32> to vector<16x128xbf16>
    %c0_8 = arith.constant 0 : index
    %c0_9 = arith.constant 0 : index
    %9 = vector.load %arg5[%c0_8, %c0_9] : memref<16x128xbf16, #tpu.memory_space<vmem>>, vector<16x128xbf16>
    tpu.vector_store %arg5[%c0_8, %c0_9], %8 {strides = array<i32>} : memref<16x128xbf16, #tpu.memory_space<vmem>>, vector<16x128xbf16>,
    %c0_10 = arith.constant 0 : index
    %c0_11 = arith.constant 0 : index
    %10 = vector.load %arg6[%c0_10, %c0_11] : memref<16x128xf32, #tpu.memory_space<vmem>>, vector<16x128xf32>
    tpu.vector_store %arg6[%c0_10, %c0_11], %7 {strides = array<i32>} : memref<16x128xf32, #tpu.memory_space<vmem>>, vector<16x128xf32>,
    return
  }
  func.func @transform_0(%arg0: i32) -> (i32, i32) {
    %c0_i32 = arith.constant 0 : i32
    %c0_i32_0 = arith.constant 0 : i32
    return %arg0, %c0_i32 : i32, i32
  }
  func.func @transform_1(%arg0: i32) -> (i32, i32) {
    %c0_i32 = arith.constant 0 : i32
    %c0_i32_0 = arith.constant 0 : i32
    %c0_i32_1 = arith.constant 0 : i32
    return %c0_i32, %c0_i32_0 : i32, i32
  }
  func.func @transform_2(%arg0: i32) -> (i32, i32) {
    %c0_i32 = arith.constant 0 : i32
    %c0_i32_0 = arith.constant 0 : i32
    %c0_i32_1 = arith.constant 0 : i32
    return %c0_i32, %c0_i32_0 : i32, i32
  }
  func.func @transform_3(%arg0: i32) -> (i32, i32) {
    %c0_i32 = arith.constant 0 : i32
    %c0_i32_0 = arith.constant 0 : i32
    %c0_i32_1 = arith.constant 0 : i32
    return %c0_i32, %c0_i32_0 : i32, i32
  }
  func.func @transform_4(%arg0: i32) -> (i32, i32) {
    %c0_i32 = arith.constant 0 : i32
    %c0_i32_0 = arith.constant 0 : i32
    return %arg0, %c0_i32 : i32, i32
  }
  func.func @transform_5(%arg0: i32) -> (i32, i32) {
    %c0_i32 = arith.constant 0 : i32
    %c0_i32_0 = arith.constant 0 : i32
    return %arg0, %c0_i32 : i32, i32
  }
}

</mosaic_0001>

<bundles_post_ra>
// kernel: tpu_custom_call.1
= control target key start
LH: loop header
LB: loop body
LE: loop exit
PB: predicated region body
PF: predicated region fallthrough
CT: control target
= control target key end

     0   :  { %11 = vsyncpa [#allocation3], 0  ;;  %s695_s0 = inlined_call_operand.hbm [shape: bf16[16,128], index: 0, kind: input, shape index: {}]   ;;  %s696_s1 = inlined_call_operand.hbm [shape: bf16[128,128], index: 1, kind: input, shape index: {}]   ;;  %s697_s2 = inlined_call_operand.hbm [shape: bf16[128,128], index: 2, kind: input, shape index: {}]   ;;  %s698_s3 = inlined_call_operand.vmem [shape: f32[1,128], index: 3, kind: input, shape index: {}]   ;;  %s699_s4 = inlined_call_operand.hbm [shape: bf16[16,128], index: 4, kind: output, shape index: {0}]   ;;  %s700_s5 = inlined_call_operand.hbm [shape: f32[16,128], index: 5, kind: output, shape index: {1}]  }
   0x1   :  { %12 = vsyncpa [#allocation6], 0 }
   0x2   :  { %13 = vsyncpa [#allocation4], 0 }
   0x3   :  { %14 = vsyncpa [#allocation10], 0  ;;  %s565_s18 = smov [#allocation5]   ;;  %s566_s20 = smov [#allocation2]  }
   0x4   :  { %s32_s19 = sshll.u32 %s565_s18, 4  ;;  %s20_s21 = sshll.u32 %s566_s20, 4  ;;  %s33_s19 = int_to_ptr.vmem [resolvable:$true] %s32_s19  ;;  %s606_s21 = int_to_ptr.vmem [resolvable:$true] %s20_s21 }
   0x5   :  { %s447_s24 = scalar_lea.hbm %s696_s1, 1024 }
   0x6   :  { %p448_p0 = scmp.ne.s32.totalorder %s696_s1, %s447_s24  ;;  %p451_p1 = scmp.lt.u32.totalorder %s447_s24, %s696_s1 }
   0x8   :  { %p453_p2 = pnand %p451_p1, %p448_p0 }
   0xa   :  { %456 = shalt.err (!%p453_p2)
}
   0xb   :  { %s457_s29 = scalar_lea.vmem %s33_s19, 1024  ;;  %p462_p4 = scmp.lt.s32.totalorder %s33_s19, %s33_s19 }
   0xc   :  { %p458_p3 = scmp.ne.s32.totalorder %s33_s19, %s457_s29  ;;  %p463_p5 = scmp.lt.s32.totalorder %s457_s29, %s457_s29 }
   0xe   :  { %p464_p6 = por %p463_p5, %p462_p4 }
  0x10   :  { %p465_p7 = pnand %p464_p6, %p458_p3 }
  0x12   :  { %468 = shalt.err (!%p465_p7)
}
  0x13   :  { %s567_s30 = smov 64   ;;  %s568_s6 = smov 4  }
  0x14   :  { %38 = dma.hbm_to_vmem [thread:$0]  %s696_s1, 1024, %s33_s19, [#allocation6], %s567_s30, %s567_s30, %s568_s6  }
  0x15   :  { %s469_s11 = scalar_lea.hbm %s695_s0, 128 }
  0x16   :  { %p470_p8 = scmp.ne.s32.totalorder %s695_s0, %s469_s11  ;;  %p473_p9 = scmp.lt.u32.totalorder %s469_s11, %s695_s0 }
  0x18   :  { %p475_p10 = pnand %p473_p9, %p470_p8 }
  0x1a   :  { %478 = shalt.err (!%p475_p10)
}
  0x1b   :  { %s479_s16 = scalar_lea.vmem %s606_s21, 128  ;;  %p484_p12 = scmp.lt.s32.totalorder %s606_s21, %s606_s21 }
  0x1c   :  { %p480_p11 = scmp.ne.s32.totalorder %s606_s21, %s479_s16  ;;  %p485_p13 = scmp.lt.s32.totalorder %s479_s16, %s479_s16 }
  0x1e   :  { %p486_p0 = por %p485_p13, %p484_p12 }
  0x20   :  { %p487_p1 = pnand %p486_p0, %p480_p11 }
  0x22   :  { %490 = shalt.err (!%p487_p1)
}
  0x23   :  { %26 = dma.hbm_to_vmem [thread:$0]  %s695_s0, 128, %s606_s21, [#allocation3], %s567_s30, %s567_s30, %s568_s6  }
  0x24   :  { %s569_s18 = smov [#allocation7]   ;;  %s491_s23 = scalar_lea.hbm %s697_s2, 1024 }
  0x25   :  { %s44_s19 = sshll.u32 %s569_s18, 4  ;;  %p492_p2 = scmp.ne.s32.totalorder %s697_s2, %s491_s23  ;;  %s45_s19 = int_to_ptr.vmem [resolvable:$true] %s44_s19 }
  0x26   :  { %p495_p3 = scmp.lt.u32.totalorder %s491_s23, %s697_s2 }
  0x28   :  { %p497_p4 = pnand %p495_p3, %p492_p2 }
  0x2a   :  { %500 = shalt.err (!%p497_p4)
}
  0x2b   :  { %s501_s28 = scalar_lea.vmem %s45_s19, 1024  ;;  %p506_p6 = scmp.lt.s32.totalorder %s45_s19, %s45_s19 }
  0x2c   :  { %p502_p5 = scmp.ne.s32.totalorder %s45_s19, %s501_s28  ;;  %p507_p7 = scmp.lt.s32.totalorder %s501_s28, %s501_s28 }
  0x2e   :  { %p508_p8 = por %p507_p7, %p506_p6 }
  0x30   :  { %p509_p9 = pnand %p508_p8, %p502_p5 }
  0x32   :  { %512 = shalt.err (!%p509_p9)
}
  0x33   :  { %50 = dma.hbm_to_vmem [thread:$0]  %s697_s2, 1024, %s45_s19, [#allocation6], %s567_s30, %s567_s30, %s568_s6  }
  0x34   :  { %557 = dma.done.wait [#allocation3], 128  }
  0x35   :  { %558 = vsyncadd [#allocation3], 4294967168 }
  0x36   :  { %559 = dma.done.wait [#allocation6], 2048  }
  0x37   :  { %560 = vsyncadd [#allocation6], 4294965248  ;;  %v570_v0 = vmov 0.0   ;;  %vm571_vm0 = vmmov 0   ;;  %v430_v1 = vld [vmem:[#allocation5] sm:$0xff]   ;;  %v432_v3 = vld [vmem:[#allocation5 + $0x8] sm:$0xff]  }
  0x38   :  { %379 = vmatprep.subr.bf16.mxu0 %v570_v0  ;;  %399 = vmatprep.subr.bf16.mxu1 %v570_v0  ;;  %v431_v2 = vld [vmem:[#allocation7] sm:$0xff]   ;;  %v433_v4 = vld [vmem:[#allocation7 + $0x8] sm:$0xff]   ;;  %v434_v5 = vld [vmem:[#allocation5 + $0x10] sm:$0xff]   ;;  %s572_s7 = smov [#allocation8]   ;;  %s573_s9 = smov [#allocation9]  }
  0x39   :  { %395 = vmatprep.mubr.msk.bf16.mxu0 %vm571_vm0, %v570_v0  ;;  %415 = vmatprep.mubr.msk.bf16.mxu1 %vm571_vm0, %v570_v0  ;;  %v435_v6 = vld [vmem:[#allocation7 + $0x10] sm:$0xff]   ;;  %v436_v7 = vld [vmem:[#allocation5 + $0x18] sm:$0xff]   ;;  %v438_v9 = vld [vmem:[#allocation5 + $0x20] sm:$0xff]   ;;  %s305_s8 = sshll.u32 %s572_s7, 4  ;;  %s317_s10 = sshll.u32 %s573_s9, 4  ;;  %s306_s8 = int_to_ptr.vmem [resolvable:$true] %s305_s8  ;;  %s661_s10 = int_to_ptr.vmem [resolvable:$true] %s317_s10 }
  0x3a   :  { %380 = vmatpush3.bf16.msra.mxu0 %v430_v1  ;;  %400 = vmatpush3.bf16.msra.mxu1 %v431_v2  ;;  %v437_v8 = vld [vmem:[#allocation7 + $0x18] sm:$0xff]   ;;  %v439_v10 = vld [vmem:[#allocation7 + $0x20] sm:$0xff]   ;;  %v440_v11 = vld [vmem:[#allocation5 + $0x28] sm:$0xff]   ;;  %p518_p11 = scmp.lt.s32.totalorder %s306_s8, %s306_s8 }
  0x3b   :  { %381 = vmatprep.subr.bf16.mxu0 %v570_v0  ;;  %401 = vmatprep.subr.bf16.mxu1 %v570_v0  ;;  %v441_v12 = vld [vmem:[#allocation7 + $0x28] sm:$0xff]   ;;  %v442_v13 = vld [vmem:[#allocation5 + $0x30] sm:$0xff]   ;;  %v444_v15 = vld [vmem:[#allocation5 + $0x38] sm:$0xff]  }
  0x3c   :  { %v443_v14 = vld [vmem:[#allocation7 + $0x30] sm:$0xff]   ;;  %v445_v16 = vld [vmem:[#allocation7 + $0x38] sm:$0xff]  }
  0x3d   :  { %v446_v17 = vld [vmem:[#allocation2] sm:$0xff]  }
  0x3e   :  { %382 = vmatpush3.bf16.msra.mxu0 %v432_v3  ;;  %402 = vmatpush3.bf16.msra.mxu1 %v433_v4  ;;  %v343_v18 = vld [vmem:[%s698_s3] ss:$0 sm:$0xff]  ;;  %s513_s3 = scalar_lea.vmem %s306_s8, 128 }
  0x3f   :  { %383 = vmatprep.subr.bf16.mxu0 %v570_v0  ;;  %403 = vmatprep.subr.bf16.mxu1 %v570_v0  ;;  %p514_p10 = scmp.ne.s32.totalorder %s306_s8, %s513_s3  ;;  %p519_p12 = scmp.lt.s32.totalorder %s513_s3, %s513_s3 }
  0x41   :  { %p520_p13 = por %p519_p12, %p518_p11 }
  0x42   :  { %384 = vmatpush3.bf16.msra.mxu0 %v434_v5  ;;  %404 = vmatpush3.bf16.msra.mxu1 %v435_v6 }
  0x43   :  { %385 = vmatprep.subr.bf16.mxu0 %v570_v0  ;;  %405 = vmatprep.subr.bf16.mxu1 %v570_v0  ;;  %p521_p0 = pnand %p520_p13, %p514_p10 }
  0x46   :  { %386 = vmatpush3.bf16.msra.mxu0 %v436_v7  ;;  %406 = vmatpush3.bf16.msra.mxu1 %v437_v8 }
  0x47   :  { %387 = vmatprep.subr.bf16.mxu0 %v570_v0  ;;  %407 = vmatprep.subr.bf16.mxu1 %v570_v0 }
  0x4a   :  { %388 = vmatpush3.bf16.msra.mxu0 %v438_v9  ;;  %408 = vmatpush3.bf16.msra.mxu1 %v439_v10 }
  0x4b   :  { %389 = vmatprep.subr.bf16.mxu0 %v570_v0  ;;  %409 = vmatprep.subr.bf16.mxu1 %v570_v0 }
  0x4e   :  { %390 = vmatpush3.bf16.msra.mxu0 %v440_v11  ;;  %410 = vmatpush3.bf16.msra.mxu1 %v441_v12 }
  0x4f   :  { %391 = vmatprep.subr.bf16.mxu0 %v570_v0  ;;  %411 = vmatprep.subr.bf16.mxu1 %v570_v0 }
  0x52   :  { %392 = vmatpush3.bf16.msra.mxu0 %v442_v13  ;;  %412 = vmatpush3.bf16.msra.mxu1 %v443_v14 }
  0x53   :  { %393 = vmatprep.subr.bf16.mxu0 %v570_v0  ;;  %413 = vmatprep.subr.bf16.mxu1 %v570_v0 }
  0x56   :  { %394 = vmatpush3.bf16.msra.mxu0 %v444_v15  ;;  %414 = vmatpush3.bf16.msra.mxu1 %v445_v16 }
  0x59   :  { %396 = vmatmul.mubr.bf16.vlgmr.msra.gmra.mrb[0].mxu0 %v446_v17  ;;  %416 = vmatmul.mubr.bf16.vlgmr.msra.gmra.mrb[0].mxu1 %v446_v17 }
 0x12c   :  { %v169_v19 = vpop.f32.mrb[0].mxu0  ;;  %v281_v20 = vpop.f32.mrb[0].mxu1 }
 0x12d   :  { %v397_v21 = vpop.f32.mrb[1].mxu0  ;;  %v282_v22 = vadd.f32 %v343_v18, %v281_v20  ;;  %v417_v23 = vpop.f32.mrb[1].mxu1 }
 0x12e   :  { %v172_v24 = vpop.f32.mrb[2].mxu0  ;;  %v284_v26 = vpop.f32.mrb[2].mxu1 }
 0x12f   :  { %v359_v25 = vpack.c.bf16 %v172_v24, %v169_v19  ;;  %v398_v27 = vpop.f32.mrb[3].mxu0  ;;  %298 = vst [vmem:[#allocation9] sm:$0xff] %v282_v22  ;;  %v285_v28 = vadd.f32 %v343_v18, %v284_v26  ;;  %v418_v29 = vpop.f32.mrb[3].mxu1 }
 0x131   :  { %360 = vst [vmem:[#allocation8] sm:$0xff] %v359_v25   ;;  %299 = vst [vmem:[#allocation9 + $0x8] sm:$0xff] %v285_v28 }
 0x132   :  { %524 = shalt.err (!%p521_p0)
}
 0x133   :  { %s525_s13 = scalar_lea.hbm %s699_s4, 128 }
 0x134   :  { %p526_p1 = scmp.ne.s32.totalorder %s699_s4, %s525_s13  ;;  %p529_p2 = scmp.lt.u32.totalorder %s525_s13, %s699_s4 }
 0x136   :  { %p531_p3 = pnand %p529_p2, %p526_p1 }
 0x138   :  { %534 = shalt.err (!%p531_p3)
}
 0x139   :  { %311 = dma.vmem_to_hbm [thread:$0]  %s306_s8, 128, %s699_s4, [#allocation4], %s567_s30, %s567_s30, %s568_s6  }
 0x13a   :  { %s535_s19 = scalar_lea.vmem %s661_s10, 256  ;;  %p540_p5 = scmp.lt.s32.totalorder %s661_s10, %s661_s10 }
 0x13b   :  { %p536_p4 = scmp.ne.s32.totalorder %s661_s10, %s535_s19  ;;  %p541_p6 = scmp.lt.s32.totalorder %s535_s19, %s535_s19 }
 0x13d   :  { %p542_p7 = por %p541_p6, %p540_p5 }
 0x13f   :  { %p543_p8 = pnand %p542_p7, %p536_p4 }
 0x141   :  { %546 = shalt.err (!%p543_p8)
}
 0x142   :  { %s547_s23 = scalar_lea.hbm %s700_s5, 256 }
 0x143   :  { %p548_p9 = scmp.ne.s32.totalorder %s700_s5, %s547_s23  ;;  %p551_p10 = scmp.lt.u32.totalorder %s547_s23, %s700_s5 }
 0x145   :  { %p553_p11 = pnand %p551_p10, %p548_p9 }
 0x147   :  { %556 = shalt.err (!%p553_p11)
}
 0x148   :  { %s574_s4 = smov 128   ;;  %s575_s30 = smov 8  }
 0x149   :  { %323 = dma.vmem_to_hbm [thread:$0]  %s661_s10, 256, %s700_s5, [#allocation10], %s574_s4, %s574_s4, %s575_s30  }
 0x14a   :  { %561 = dma.done.wait [#allocation4], 128  }
 0x14b   :  { %562 = vsyncadd [#allocation4], 4294967168 }
 0x14c   :  { %563 = dma.done.wait [#allocation10], 256  }
 0x14d   :  { %564 = vsyncadd [#allocation10], 4294967040 }
 0x14e   :  { %330 = vsyncpa [#allocation3], 1 }
 0x14f   :  { %331 = vsyncpa [#allocation6], 1 }
 0x150   :  { %332 = vsyncpa [#allocation4], 1 }
 0x151   :  { %333 = vsyncpa [#allocation10], 1 }

</bundles_post_ra>
